<compile_context>
chip_gen: v7x
topology: tpu7x:2x2x1
jax: 0.10.0
libtpu: 0.0.40
codegen_flags: <defaults>
</compile_context>

<pallas_src>
import jax
import jax.numpy as jnp
from jax.experimental import pallas as pl
from jax.experimental.pallas import tpu as pltpu


# ----------------------------------------------------------------------------- kernel


def _od_linear_kernel(x_ref, w_ref, b_ref, o_ref):
    # x_ref: (B_TILE, T*C)   w_ref: (T*C, O*C)   b_ref: (1, O*C)   o_ref: (B_TILE, O*C)
    # One lane-dense MXU matmul per grid step; f32 accumulate; bias add on the VPU.
    acc = jnp.dot(x_ref[...], w_ref[...], preferred_element_type=jnp.float32)
    o_ref[...] = (acc + b_ref[...].astype(jnp.float32)).astype(o_ref.dtype)


# ----------------------------------------------------------------------------- wrapper


def prepare_params(weight, bias):
    """Pre-materialize the kernel-layout parameters ONCE (not per forward call).

    weight: [C, O, T]  (C independent nn.Linear(T, O) weights, torch [out, in] layout)
    bias:   [C, O]
    Returns:
      w_bd: [T*C, O*C]  with w_bd[t*C + c, o*C + c] = weight[c, o, t], zeros elsewhere
      b_bd: [1,  O*C]   with b_bd[0, o*C + c] = bias[c, o]
    These flat layouts match x.reshape(B, T*C) and out.reshape(B, O, N, N) directly,
    so the forward needs no activation transposes at all.
    """
    C, O, T = weight.shape
    eye = jnp.eye(C, dtype=weight.dtype)
    # w4[t, c_in, o, c_out] = weight[c_in, o, t] * (c_in == c_out)
    w_bd = jnp.einsum("cot,cd->tcod", weight, eye).reshape(T * C, O * C)
    b_bd = jnp.transpose(bias, (1, 0)).reshape(1, O * C)
    return w_bd, b_bd


def _choose_b_tile(B, TC, OC, itemsize):
    """Fold as many batch rows per grid step as a conservative VMEM budget allows
    (memory-bound kernel: big DMAs amortize per-step overhead), keep sublane (8)
    alignment, and keep >= 2 grid steps (v7x megacore) when the batch is big."""
    vmem_budget = 24 << 20                      # conservative vs 32 MiB scoped default
    weight_bytes = 2 * TC * OC * itemsize       # worst case: double-buffered weights
    per_row = 2 * (TC + OC) * itemsize          # double-buffered x + out blocks per row
    cap = int(max((vmem_budget - weight_bytes) // per_row, 8))
    cap = min(cap, 1024)
    if B <= 8:
        return B                                # full-extent block (always legal)
    tile = min(cap, max(8, B // 2))             # at least 2 grid steps when batch allows
    return max(8, (tile // 8) * 8)


def _build_call(B, TC, OC, b_tile, out_dtype, single_buffer_params):
    grid = (pl.cdiv(B, b_tile),)
    if single_buffer_params:
        # Grid-invariant operands: double-buffering gives no pipelining benefit and
        # doubles VMEM residency — request a single buffer.
        w_spec = pl.BlockSpec((TC, OC), lambda b: (0, 0), pipeline_mode=pl.Buffered(1))
        b_spec = pl.BlockSpec((1, OC), lambda b: (0, 0), pipeline_mode=pl.Buffered(1))
    else:
        w_spec = pl.BlockSpec((TC, OC), lambda b: (0, 0))
        b_spec = pl.BlockSpec((1, OC), lambda b: (0, 0))
    return pl.pallas_call(
        _od_linear_kernel,
        out_shape=jax.ShapeDtypeStruct((B, OC), out_dtype),
        grid_spec=pltpu.PrefetchScalarGridSpec(
            num_scalar_prefetch=0,
            grid=grid,
            in_specs=[
                pl.BlockSpec((b_tile, TC), lambda b: (b, 0)),   # batch tile of x
                w_spec,                                         # full block-structured weight
                b_spec,                                         # full bias row
            ],
            out_specs=pl.BlockSpec((b_tile, OC), lambda b: (b, 0)),
        ),
        compiler_params=pltpu.CompilerParams(
            dimension_semantics=("parallel",)),
    )


_BUFFERED_SINGLE_OK = None  # memoized capability probe for pl.Buffered(1)


def od_linear_forward(x, w_bd, b_bd):
    """x: [B, T, N, N], (w_bd, b_bd) from prepare_params() -> [B, O, N, N]."""
    global _BUFFERED_SINGLE_OK
    B, T, N, _ = x.shape
    C = N * N
    TC = T * C
    OC = b_bd.shape[-1]
    O = OC // C
    assert w_bd.shape == (TC, OC)

    # Natural flat layout: x_flat[b, t*C + c] = x[b, t, c]  (no transpose needed).
    x_flat = x.reshape(B, TC)
    b_tile = _choose_b_tile(B, TC, OC, jnp.dtype(x.dtype).itemsize)
    # Note: for very large num_nodes the dense [T*C, O*C] weight would exceed VMEM;
    # a channel-group-blocked variant (128-wide lane chunks) would be used instead.

    if _BUFFERED_SINGLE_OK is None:
        try:
            out_flat = jax.block_until_ready(
                _build_call(B, TC, OC, b_tile, x.dtype, True)(x_flat, w_bd, b_bd))
            _BUFFERED_SINGLE_OK = True
            return out_flat.reshape(B, O, N, N)
        except Exception:
            _BUFFERED_SINGLE_OK = False   # this Pallas build doesn't take Buffered(1)

    out_flat = _build_call(B, TC, OC, b_tile, x.dtype, _BUFFERED_SINGLE_OK)(
        x_flat, w_bd, b_bd)
    return out_flat.reshape(B, O, N, N)


# ----------------------------------------------------------------------------- reference


def _reference(x, weight, bias):
    # Pure-JAX reference of the per-channel Linear loop.
    B, T, N, _ = x.shape
    C = N * N
    x_cl = x.reshape(B, T, C)
    # out[b, o, c] = sum_t weight[c, o, t] * x[b, t, c] + bias[c, o]
    out = jnp.einsum("cot,btc->boc", weight, x_cl) + jnp.transpose(bias, (1, 0))[None]
    return out.reshape(B, weight.shape[1], N, N)


if __name__ == "__main__":
    # Small shapes consistent with the module's forward (T*C = O*C = 128 here:
    # exactly one lane-dense MXU tile per step).
    B, N = 2, 4
    in_seq_len = 8
    out_seq_len = 8          # the module's final reshape requires O == T
    C = N * N

    key = jax.random.PRNGKey(0)
    kx, kw, kb = jax.random.split(key, 3)

    # Deterministic parameter init (shapes match C independent nn.Linear(T, O)).
    bound = 1.0 / (in_seq_len ** 0.5)
    weight = jax.random.uniform(kw, (C, out_seq_len, in_seq_len),
                                minval=-bound, maxval=bound, dtype=jnp.float32)
    bias = jax.random.uniform(kb, (C, out_seq_len),
                              minval=-bound, maxval=bound, dtype=jnp.float32)

    x = jax.random.normal(kx, (B, in_seq_len, N, N), dtype=jnp.float32)

    # Kernel-layout params built once, outside the forward (perf-review item).
    w_bd, b_bd = prepare_params(weight, bias)

    # te, se, pe, adj, s_adj are unused in the PyTorch forward; omitted here.
    out = od_linear_forward(x, w_bd, b_bd)
    out = jax.block_until_ready(out)

    ref = _reference(x, weight, bias)
    assert out.shape == (B, out_seq_len, N, N)
    # MXU f32 contraction at DEFAULT precision may internally use bf16 passes on
    # some TPU generations; the tolerance accounts for that while still catching
    # any layout/formulation bug (those would produce O(1) errors).
    assert jnp.allclose(out, ref, atol=1e-2, rtol=1e-2), \
        float(jnp.max(jnp.abs(out - ref)))

    print("KERNEL_OK")
</pallas_src>

<mosaic_0001>
module attributes {stable_mosaic.version = 11 : i64} {
  func.func @_od_linear_kernel(%arg0: i32, %arg1: memref<2x128xf32, #tpu.memory_space<vmem>>, %arg2: memref<128x128xf32, #tpu.memory_space<vmem>>, %arg3: memref<1x128xf32, #tpu.memory_space<vmem>>, %arg4: memref<2x128xf32, #tpu.memory_space<vmem>>) attributes {dimension_semantics = [#tpu.dimension_semantics<parallel>], iteration_bounds = array<i64: 1>, scalar_prefetch = 0 : i64, scratch_operands = 0 : i64, tpu.core_type = #tpu.core_type<tc>, window_params = [{transform_indices = @transform_0, window_bounds = array<i64: 2, 128>}, {pipeline_mode = #tpu.pipeline_mode<synchronous>, transform_indices = @transform_1, window_bounds = array<i64: 128, 128>}, {pipeline_mode = #tpu.pipeline_mode<synchronous>, transform_indices = @transform_2, window_bounds = array<i64: 1, 128>}, {transform_indices = @transform_3, window_bounds = array<i64: 2, 128>}]} {
    %c0 = arith.constant 0 : index
    %c0_0 = arith.constant 0 : index
    %0 = vector.load %arg1[%c0, %c0_0] : memref<2x128xf32, #tpu.memory_space<vmem>>, vector<2x128xf32>
    %c0_1 = arith.constant 0 : index
    %c0_2 = arith.constant 0 : index
    %1 = vector.load %arg2[%c0_1, %c0_2] : memref<128x128xf32, #tpu.memory_space<vmem>>, vector<128x128xf32>
    %cst = arith.constant dense<0.000000e+00> : vector<2x128xf32>
    %2 = tpu.matmul %0, %1, %cst {dimension_numbers = #tpu.dot_dimension_numbers<[1], [0], [0], [1], [0, 0, 1, 1], [], []>} : vector<2x128xf32>, vector<128x128xf32>, vector<2x128xf32> -> vector<2x128xf32>
    %c0_3 = arith.constant 0 : index
    %c0_4 = arith.constant 0 : index
    %3 = vector.load %arg3[%c0_3, %c0_4] : memref<1x128xf32, #tpu.memory_space<vmem>>, vector<1x128xf32>
    %4 = vector.broadcast %3 : vector<1x128xf32> to vector<2x128xf32>
    %5 = arith.addf %2, %4 : vector<2x128xf32>
    %c0_5 = arith.constant 0 : index
    %c0_6 = arith.constant 0 : index
    %6 = vector.load %arg4[%c0_5, %c0_6] : memref<2x128xf32, #tpu.memory_space<vmem>>, vector<2x128xf32>
    tpu.vector_store %arg4[%c0_5, %c0_6], %5 {strides = array<i32>} : memref<2x128xf32, #tpu.memory_space<vmem>>, vector<2x128xf32>,
    return
  }
  func.func @transform_0(%arg0: i32) -> (i32, i32) {
    %c0_i32 = arith.constant 0 : i32
    %c0_i32_0 = arith.constant 0 : i32
    return %arg0, %c0_i32 : i32, i32
  }
  func.func @transform_1(%arg0: i32) -> (i32, i32) {
    %c0_i32 = arith.constant 0 : i32
    %c0_i32_0 = arith.constant 0 : i32
    %c0_i32_1 = arith.constant 0 : i32
    return %c0_i32, %c0_i32_0 : i32, i32
  }
  func.func @transform_2(%arg0: i32) -> (i32, i32) {
    %c0_i32 = arith.constant 0 : i32
    %c0_i32_0 = arith.constant 0 : i32
    %c0_i32_1 = arith.constant 0 : i32
    return %c0_i32, %c0_i32_0 : i32, i32
  }
  func.func @transform_3(%arg0: i32) -> (i32, i32) {
    %c0_i32 = arith.constant 0 : i32
    %c0_i32_0 = arith.constant 0 : i32
    return %arg0, %c0_i32 : i32, i32
  }
}

module attributes {stable_mosaic.version = 11 : i64} {
  func.func @_od_linear_kernel(%arg0: i32, %arg1: memref<2x128xf32, #tpu.memory_space<vmem>>, %arg2: memref<128x128xf32, #tpu.memory_space<vmem>>, %arg3: memref<1x128xf32, #tpu.memory_space<vmem>>, %arg4: memref<2x128xf32, #tpu.memory_space<vmem>>) attributes {dimension_semantics = [#tpu.dimension_semantics<parallel>], iteration_bounds = array<i64: 1>, scalar_prefetch = 0 : i64, scratch_operands = 0 : i64, tpu.core_type = #tpu.core_type<tc>, window_params = [{transform_indices = @transform_0, window_bounds = array<i64: 2, 128>}, {pipeline_mode = #tpu.pipeline_mode<synchronous>, transform_indices = @transform_1, window_bounds = array<i64: 128, 128>}, {pipeline_mode = #tpu.pipeline_mode<synchronous>, transform_indices = @transform_2, window_bounds = array<i64: 1, 128>}, {transform_indices = @transform_3, window_bounds = array<i64: 2, 128>}]} {
    %c0 = arith.constant 0 : index
    %c0_0 = arith.constant 0 : index
    %0 = vector.load %arg1[%c0, %c0_0] : memref<2x128xf32, #tpu.memory_space<vmem>>, vector<2x128xf32>
    %c0_1 = arith.constant 0 : index
    %c0_2 = arith.constant 0 : index
    %1 = vector.load %arg2[%c0_1, %c0_2] : memref<128x128xf32, #tpu.memory_space<vmem>>, vector<128x128xf32>
    %cst = arith.constant dense<0.000000e+00> : vector<2x128xf32>
    %2 = tpu.matmul %0, %1, %cst {dimension_numbers = #tpu.dot_dimension_numbers<[1], [0], [0], [1], [0, 0, 1, 1], [], []>} : vector<2x128xf32>, vector<128x128xf32>, vector<2x128xf32> -> vector<2x128xf32>
    %c0_3 = arith.constant 0 : index
    %c0_4 = arith.constant 0 : index
    %3 = vector.load %arg3[%c0_3, %c0_4] : memref<1x128xf32, #tpu.memory_space<vmem>>, vector<1x128xf32>
    %4 = vector.broadcast %3 : vector<1x128xf32> to vector<2x128xf32>
    %5 = arith.addf %2, %4 : vector<2x128xf32>
    %c0_5 = arith.constant 0 : index
    %c0_6 = arith.constant 0 : index
    %6 = vector.load %arg4[%c0_5, %c0_6] : memref<2x128xf32, #tpu.memory_space<vmem>>, vector<2x128xf32>
    tpu.vector_store %arg4[%c0_5, %c0_6], %5 {strides = array<i32>} : memref<2x128xf32, #tpu.memory_space<vmem>>, vector<2x128xf32>,
    return
  }
  func.func @transform_0(%arg0: i32) -> (i32, i32) {
    %c0_i32 = arith.constant 0 : i32
    %c0_i32_0 = arith.constant 0 : i32
    return %arg0, %c0_i32 : i32, i32
  }
  func.func @transform_1(%arg0: i32) -> (i32, i32) {
    %c0_i32 = arith.constant 0 : i32
    %c0_i32_0 = arith.constant 0 : i32
    %c0_i32_1 = arith.constant 0 : i32
    return %c0_i32, %c0_i32_0 : i32, i32
  }
  func.func @transform_2(%arg0: i32) -> (i32, i32) {
    %c0_i32 = arith.constant 0 : i32
    %c0_i32_0 = arith.constant 0 : i32
    %c0_i32_1 = arith.constant 0 : i32
    return %c0_i32, %c0_i32_0 : i32, i32
  }
  func.func @transform_3(%arg0: i32) -> (i32, i32) {
    %c0_i32 = arith.constant 0 : i32
    %c0_i32_0 = arith.constant 0 : i32
    return %arg0, %c0_i32 : i32, i32
  }
}

</mosaic_0001>

<bundles_post_ra>
// kernel: tpu_custom_call.1
= control target key start
LH: loop header
LB: loop body
LE: loop exit
PB: predicated region body
PF: predicated region fallthrough
CT: control target
= control target key end

     0   :  { %8 = vsyncpa [#allocation3], 0  ;;  %s383_s0 = inlined_call_operand.hbm [shape: f32[2,128], index: 0, kind: input, shape index: {}]   ;;  %s384_s1 = inlined_call_operand.hbm [shape: f32[128,128], index: 1, kind: input, shape index: {}]   ;;  %s385_s2 = inlined_call_operand.vmem [shape: f32[1,128], index: 2, kind: input, shape index: {}]   ;;  %s386_s3 = inlined_call_operand.hbm [shape: f32[2,128], index: 3, kind: output, shape index: {}]  }
   0x1   :  { %9 = vsyncpa [#allocation6], 0 }
   0x2   :  { %10 = vsyncpa [#allocation4], 0  ;;  %s309_s12 = smov [#allocation2]   ;;  %s310_s14 = smov [#allocation5]  }
   0x3   :  { %s17_s13 = sshll.u32 %s309_s12, 4  ;;  %s26_s15 = sshll.u32 %s310_s14, 4  ;;  %s18_s13 = int_to_ptr.vmem [resolvable:$true] %s17_s13  ;;  %s337_s15 = int_to_ptr.vmem [resolvable:$true] %s26_s15 }
   0x4   :  { %s237_s18 = scalar_lea.hbm %s383_s0, 32 }
   0x5   :  { %p238_p0 = scmp.ne.s32.totalorder %s383_s0, %s237_s18  ;;  %p241_p1 = scmp.lt.u32.totalorder %s237_s18, %s383_s0 }
   0x7   :  { %p243_p2 = pnand %p241_p1, %p238_p0 }
   0x9   :  { %246 = shalt.err (!%p243_p2)
}
   0xa   :  { %s247_s23 = scalar_lea.vmem %s18_s13, 32  ;;  %p252_p4 = scmp.lt.s32.totalorder %s18_s13, %s18_s13 }
   0xb   :  { %p248_p3 = scmp.ne.s32.totalorder %s18_s13, %s247_s23  ;;  %p253_p5 = scmp.lt.s32.totalorder %s247_s23, %s247_s23 }
   0xd   :  { %p254_p6 = por %p253_p5, %p252_p4 }
   0xf   :  { %p255_p7 = pnand %p254_p6, %p248_p3 }
  0x11   :  { %258 = shalt.err (!%p255_p7)
}
  0x12   :  { %20 = dma.hbm_to_vmem [thread:$0]  %s383_s0, 32, %s18_s13, [#allocation3]  }
  0x13   :  { %s259_s28 = scalar_lea.hbm %s384_s1, 2048 }
  0x14   :  { %p260_p8 = scmp.ne.s32.totalorder %s384_s1, %s259_s28  ;;  %p263_p9 = scmp.lt.u32.totalorder %s259_s28, %s384_s1 }
  0x16   :  { %p265_p10 = pnand %p263_p9, %p260_p8 }
  0x18   :  { %268 = shalt.err (!%p265_p10)
}
  0x19   :  { %s269_s6 = scalar_lea.vmem %s337_s15, 2048  ;;  %p274_p12 = scmp.lt.s32.totalorder %s337_s15, %s337_s15 }
  0x1a   :  { %p270_p11 = scmp.ne.s32.totalorder %s337_s15, %s269_s6  ;;  %p275_p13 = scmp.lt.s32.totalorder %s269_s6, %s269_s6 }
  0x1c   :  { %p276_p0 = por %p275_p13, %p274_p12 }
  0x1e   :  { %p277_p1 = pnand %p276_p0, %p270_p11 }
  0x20   :  { %280 = shalt.err (!%p277_p1)
}
  0x21   :  { %s311_s0 = smov 128   ;;  %s312_s7 = smov 8  }
  0x22   :  { %32 = dma.hbm_to_vmem [thread:$0]  %s384_s1, 2048, %s337_s15, [#allocation6], %s311_s0, %s311_s0, %s312_s7  }
  0x23   :  { %303 = dma.done.wait [#allocation3], 32  }
  0x24   :  { %304 = vsyncadd [#allocation3], 4294967264 }
  0x25   :  { %305 = dma.done.wait [#allocation6], 2048  }
  0x26   :  { %306 = vsyncadd [#allocation6], 4294965248  ;;  %v313_v0 = vmov 0.0|0.0   ;;  %vm314_vm0 = vmmov 0   ;;  %v315_v1 = vmov 0.0   ;;  %v42_v2 = vld [vmem:[#allocation5] sm:$0xff] }
  0x27   :  { %205 = vmatprep.subr.bf16.mxu0 %v313_v0  ;;  %202 = vmatprep.mubr.msk.f32.mxu0 %vm314_vm0, %v315_v1  ;;  %v43_v3 = vld [vmem:[#allocation5 + $0x8] sm:$0xff]  ;;  %v44_v4 = vld [vmem:[#allocation5 + $0x10] sm:$0xff]  ;;  %v45_v6 = vld [vmem:[#allocation5 + $0x18] sm:$0xff]  ;;  %s316_s11 = smov [#allocation7]  }
  0x28   :  { %v206_v5 = vpack.c.bf16 %v43_v3, %v42_v2  ;;  %v209_v7 = vpack.c.bf16 %v45_v6, %v44_v4  ;;  %v46_v8 = vld [vmem:[#allocation5 + $0x20] sm:$0xff]  ;;  %v47_v9 = vld [vmem:[#allocation5 + $0x28] sm:$0xff]  ;;  %v48_v11 = vld [vmem:[#allocation5 + $0x30] sm:$0xff]  ;;  %s142_s12 = sshll.u32 %s316_s11, 4  ;;  %s143_s12 = int_to_ptr.vmem [resolvable:$true] %s142_s12 }
  0x29   :  { %v212_v10 = vpack.c.bf16 %v47_v9, %v46_v8  ;;  %v49_v12 = vld [vmem:[#allocation5 + $0x38] sm:$0xff]  ;;  %v50_v14 = vld [vmem:[#allocation5 + $0x40] sm:$0xff]  ;;  %v51_v15 = vld [vmem:[#allocation5 + $0x48] sm:$0xff]  ;;  %s281_s13 = scalar_lea.vmem %s143_s12, 32  ;;  %p286_p3 = scmp.lt.s32.totalorder %s143_s12, %s143_s12 }
  0x2a   :  { %207 = vmatpush3.bf16.msra.mxu0 %v206_v5  ;;  %v215_v13 = vpack.c.bf16 %v49_v12, %v48_v11  ;;  %v218_v16 = vpack.c.bf16 %v51_v15, %v50_v14  ;;  %v52_v17 = vld [vmem:[#allocation5 + $0x50] sm:$0xff]  ;;  %v53_v18 = vld [vmem:[#allocation5 + $0x58] sm:$0xff]  ;;  %v54_v20 = vld [vmem:[#allocation5 + $0x60] sm:$0xff]  ;;  %p282_p2 = scmp.ne.s32.totalorder %s143_s12, %s281_s13  ;;  %p287_p4 = scmp.lt.s32.totalorder %s281_s13, %s281_s13 }
  0x2b   :  { %208 = vmatprep.subr.bf16.mxu0 %v313_v0  ;;  %v221_v19 = vpack.c.bf16 %v53_v18, %v52_v17  ;;  %v55_v21 = vld [vmem:[#allocation5 + $0x68] sm:$0xff]  ;;  %v56_v23 = vld [vmem:[#allocation5 + $0x70] sm:$0xff]  ;;  %v57_v24 = vld [vmem:[#allocation5 + $0x78] sm:$0xff] }
  0x2c   :  { %v224_v22 = vpack.c.bf16 %v55_v21, %v54_v20  ;;  %v227_v25 = vpack.c.bf16 %v57_v24, %v56_v23  ;;  %v41_v26 = vld [vmem:[#allocation2] sm:$0x3]  ;;  %p288_p5 = por %p287_p4, %p286_p3 }
  0x2d   :  { %v152_v27 = vld [vmem:[%s385_s2] ss:$0 sm:$0xff] }
  0x2e   :  { %210 = vmatpush3.bf16.msra.mxu0 %v209_v7  ;;  %p289_p6 = pnand %p288_p5, %p282_p2 }
  0x2f   :  { %211 = vmatprep.subr.bf16.mxu0 %v313_v0 }
  0x32   :  { %213 = vmatpush3.bf16.msra.mxu0 %v212_v10 }
  0x33   :  { %214 = vmatprep.subr.bf16.mxu0 %v313_v0 }
  0x36   :  { %216 = vmatpush3.bf16.msra.mxu0 %v215_v13 }
  0x37   :  { %217 = vmatprep.subr.bf16.mxu0 %v313_v0 }
  0x3a   :  { %219 = vmatpush3.bf16.msra.mxu0 %v218_v16 }
  0x3b   :  { %220 = vmatprep.subr.bf16.mxu0 %v313_v0 }
  0x3e   :  { %222 = vmatpush3.bf16.msra.mxu0 %v221_v19 }
  0x3f   :  { %223 = vmatprep.subr.bf16.mxu0 %v313_v0 }
  0x42   :  { %225 = vmatpush3.bf16.msra.mxu0 %v224_v22 }
  0x43   :  { %226 = vmatprep.subr.bf16.mxu0 %v313_v0 }
  0x46   :  { %228 = vmatpush3.bf16.msra.mxu0 %v227_v25 }
  0x49   :  { %203 = vmatmul.mubr.f32.vlgmr.msra.gmra.mrb[0].mxu0 %v41_v26 }
 0x11c   :  { %v131_v28 = vpop.f32.mrb[0].mxu0 }
 0x11d   :  { %v132_v29 = vadd.f32 %v152_v27, %v131_v28  ;;  %v204_v30 = vpop.f32.mrb[1].mxu0 }
 0x11f   :  { %135 = vst [vmem:[#allocation7] sm:$0x3] %v132_v29 }
 0x120   :  { %292 = shalt.err (!%p289_p6)
}
 0x121   :  { %s293_s16 = scalar_lea.hbm %s386_s3, 32 }
 0x122   :  { %p294_p7 = scmp.ne.s32.totalorder %s386_s3, %s293_s16  ;;  %p297_p8 = scmp.lt.u32.totalorder %s293_s16, %s386_s3 }
 0x124   :  { %p299_p9 = pnand %p297_p8, %p294_p7 }
 0x126   :  { %302 = shalt.err (!%p299_p9)
}
 0x127   :  { %145 = dma.vmem_to_hbm [thread:$0]  %s143_s12, 32, %s386_s3, [#allocation4]  }
 0x128   :  { %307 = dma.done.wait [#allocation4], 32  }
 0x129   :  { %308 = vsyncadd [#allocation4], 4294967264 }
 0x12a   :  { %149 = vsyncpa [#allocation3], 1 }
 0x12b   :  { %150 = vsyncpa [#allocation6], 1 }
 0x12c   :  { %151 = vsyncpa [#allocation4], 1 }

// kernel: tpu_custom_call.1
= control target key start
LH: loop header
LB: loop body
LE: loop exit
PB: predicated region body
PF: predicated region fallthrough
CT: control target
= control target key end

     0   :  { %8 = vsyncpa [#allocation3], 0  ;;  %s383_s0 = inlined_call_operand.hbm [shape: f32[2,128], index: 0, kind: input, shape index: {}]   ;;  %s384_s1 = inlined_call_operand.hbm [shape: f32[128,128], index: 1, kind: input, shape index: {}]   ;;  %s385_s2 = inlined_call_operand.vmem [shape: f32[1,128], index: 2, kind: input, shape index: {}]   ;;  %s386_s3 = inlined_call_operand.hbm [shape: f32[2,128], index: 3, kind: output, shape index: {}]  }
   0x1   :  { %9 = vsyncpa [#allocation6], 0 }
   0x2   :  { %10 = vsyncpa [#allocation4], 0  ;;  %s309_s12 = smov [#allocation2]   ;;  %s310_s14 = smov [#allocation5]  }
   0x3   :  { %s17_s13 = sshll.u32 %s309_s12, 4  ;;  %s26_s15 = sshll.u32 %s310_s14, 4  ;;  %s18_s13 = int_to_ptr.vmem [resolvable:$true] %s17_s13  ;;  %s337_s15 = int_to_ptr.vmem [resolvable:$true] %s26_s15 }
   0x4   :  { %s237_s18 = scalar_lea.hbm %s383_s0, 32 }
   0x5   :  { %p238_p0 = scmp.ne.s32.totalorder %s383_s0, %s237_s18  ;;  %p241_p1 = scmp.lt.u32.totalorder %s237_s18, %s383_s0 }
   0x7   :  { %p243_p2 = pnand %p241_p1, %p238_p0 }
   0x9   :  { %246 = shalt.err (!%p243_p2)
}
   0xa   :  { %s247_s23 = scalar_lea.vmem %s18_s13, 32  ;;  %p252_p4 = scmp.lt.s32.totalorder %s18_s13, %s18_s13 }
   0xb   :  { %p248_p3 = scmp.ne.s32.totalorder %s18_s13, %s247_s23  ;;  %p253_p5 = scmp.lt.s32.totalorder %s247_s23, %s247_s23 }
   0xd   :  { %p254_p6 = por %p253_p5, %p252_p4 }
   0xf   :  { %p255_p7 = pnand %p254_p6, %p248_p3 }
  0x11   :  { %258 = shalt.err (!%p255_p7)
}
  0x12   :  { %20 = dma.hbm_to_vmem [thread:$0]  %s383_s0, 32, %s18_s13, [#allocation3]  }
  0x13   :  { %s259_s28 = scalar_lea.hbm %s384_s1, 2048 }
  0x14   :  { %p260_p8 = scmp.ne.s32.totalorder %s384_s1, %s259_s28  ;;  %p263_p9 = scmp.lt.u32.totalorder %s259_s28, %s384_s1 }
  0x16   :  { %p265_p10 = pnand %p263_p9, %p260_p8 }
  0x18   :  { %268 = shalt.err (!%p265_p10)
}
  0x19   :  { %s269_s6 = scalar_lea.vmem %s337_s15, 2048  ;;  %p274_p12 = scmp.lt.s32.totalorder %s337_s15, %s337_s15 }
  0x1a   :  { %p270_p11 = scmp.ne.s32.totalorder %s337_s15, %s269_s6  ;;  %p275_p13 = scmp.lt.s32.totalorder %s269_s6, %s269_s6 }
  0x1c   :  { %p276_p0 = por %p275_p13, %p274_p12 }
  0x1e   :  { %p277_p1 = pnand %p276_p0, %p270_p11 }
  0x20   :  { %280 = shalt.err (!%p277_p1)
}
  0x21   :  { %s311_s0 = smov 128   ;;  %s312_s7 = smov 8  }
  0x22   :  { %32 = dma.hbm_to_vmem [thread:$0]  %s384_s1, 2048, %s337_s15, [#allocation6], %s311_s0, %s311_s0, %s312_s7  }
  0x23   :  { %303 = dma.done.wait [#allocation3], 32  }
  0x24   :  { %304 = vsyncadd [#allocation3], 4294967264 }
  0x25   :  { %305 = dma.done.wait [#allocation6], 2048  }
  0x26   :  { %306 = vsyncadd [#allocation6], 4294965248  ;;  %v313_v0 = vmov 0.0|0.0   ;;  %vm314_vm0 = vmmov 0   ;;  %v315_v1 = vmov 0.0   ;;  %v42_v2 = vld [vmem:[#allocation5] sm:$0xff] }
  0x27   :  { %205 = vmatprep.subr.bf16.mxu0 %v313_v0  ;;  %202 = vmatprep.mubr.msk.f32.mxu0 %vm314_vm0, %v315_v1  ;;  %v43_v3 = vld [vmem:[#allocation5 + $0x8] sm:$0xff]  ;;  %v44_v4 = vld [vmem:[#allocation5 + $0x10] sm:$0xff]  ;;  %v45_v6 = vld [vmem:[#allocation5 + $0x18] sm:$0xff]  ;;  %s316_s11 = smov [#allocation7]  }
  0x28   :  { %v206_v5 = vpack.c.bf16 %v43_v3, %v42_v2  ;;  %v209_v7 = vpack.c.bf16 %v45_v6, %v44_v4  ;;  %v46_v8 = vld [vmem:[#allocation5 + $0x20] sm:$0xff]  ;;  %v47_v9 = vld [vmem:[#allocation5 + $0x28] sm:$0xff]  ;;  %v48_v11 = vld [vmem:[#allocation5 + $0x30] sm:$0xff]  ;;  %s142_s12 = sshll.u32 %s316_s11, 4  ;;  %s143_s12 = int_to_ptr.vmem [resolvable:$true] %s142_s12 }
  0x29   :  { %v212_v10 = vpack.c.bf16 %v47_v9, %v46_v8  ;;  %v49_v12 = vld [vmem:[#allocation5 + $0x38] sm:$0xff]  ;;  %v50_v14 = vld [vmem:[#allocation5 + $0x40] sm:$0xff]  ;;  %v51_v15 = vld [vmem:[#allocation5 + $0x48] sm:$0xff]  ;;  %s281_s13 = scalar_lea.vmem %s143_s12, 32  ;;  %p286_p3 = scmp.lt.s32.totalorder %s143_s12, %s143_s12 }
  0x2a   :  { %207 = vmatpush3.bf16.msra.mxu0 %v206_v5  ;;  %v215_v13 = vpack.c.bf16 %v49_v12, %v48_v11  ;;  %v218_v16 = vpack.c.bf16 %v51_v15, %v50_v14  ;;  %v52_v17 = vld [vmem:[#allocation5 + $0x50] sm:$0xff]  ;;  %v53_v18 = vld [vmem:[#allocation5 + $0x58] sm:$0xff]  ;;  %v54_v20 = vld [vmem:[#allocation5 + $0x60] sm:$0xff]  ;;  %p282_p2 = scmp.ne.s32.totalorder %s143_s12, %s281_s13  ;;  %p287_p4 = scmp.lt.s32.totalorder %s281_s13, %s281_s13 }
  0x2b   :  { %208 = vmatprep.subr.bf16.mxu0 %v313_v0  ;;  %v221_v19 = vpack.c.bf16 %v53_v18, %v52_v17  ;;  %v55_v21 = vld [vmem:[#allocation5 + $0x68] sm:$0xff]  ;;  %v56_v23 = vld [vmem:[#allocation5 + $0x70] sm:$0xff]  ;;  %v57_v24 = vld [vmem:[#allocation5 + $0x78] sm:$0xff] }
  0x2c   :  { %v224_v22 = vpack.c.bf16 %v55_v21, %v54_v20  ;;  %v227_v25 = vpack.c.bf16 %v57_v24, %v56_v23  ;;  %v41_v26 = vld [vmem:[#allocation2] sm:$0x3]  ;;  %p288_p5 = por %p287_p4, %p286_p3 }
  0x2d   :  { %v152_v27 = vld [vmem:[%s385_s2] ss:$0 sm:$0xff] }
  0x2e   :  { %210 = vmatpush3.bf16.msra.mxu0 %v209_v7  ;;  %p289_p6 = pnand %p288_p5, %p282_p2 }
  0x2f   :  { %211 = vmatprep.subr.bf16.mxu0 %v313_v0 }
  0x32   :  { %213 = vmatpush3.bf16.msra.mxu0 %v212_v10 }
  0x33   :  { %214 = vmatprep.subr.bf16.mxu0 %v313_v0 }
  0x36   :  { %216 = vmatpush3.bf16.msra.mxu0 %v215_v13 }
  0x37   :  { %217 = vmatprep.subr.bf16.mxu0 %v313_v0 }
  0x3a   :  { %219 = vmatpush3.bf16.msra.mxu0 %v218_v16 }
  0x3b   :  { %220 = vmatprep.subr.bf16.mxu0 %v313_v0 }
  0x3e   :  { %222 = vmatpush3.bf16.msra.mxu0 %v221_v19 }
  0x3f   :  { %223 = vmatprep.subr.bf16.mxu0 %v313_v0 }
  0x42   :  { %225 = vmatpush3.bf16.msra.mxu0 %v224_v22 }
  0x43   :  { %226 = vmatprep.subr.bf16.mxu0 %v313_v0 }
  0x46   :  { %228 = vmatpush3.bf16.msra.mxu0 %v227_v25 }
  0x49   :  { %203 = vmatmul.mubr.f32.vlgmr.msra.gmra.mrb[0].mxu0 %v41_v26 }
 0x11c   :  { %v131_v28 = vpop.f32.mrb[0].mxu0 }
 0x11d   :  { %v132_v29 = vadd.f32 %v152_v27, %v131_v28  ;;  %v204_v30 = vpop.f32.mrb[1].mxu0 }
 0x11f   :  { %135 = vst [vmem:[#allocation7] sm:$0x3] %v132_v29 }
 0x120   :  { %292 = shalt.err (!%p289_p6)
}
 0x121   :  { %s293_s16 = scalar_lea.hbm %s386_s3, 32 }
 0x122   :  { %p294_p7 = scmp.ne.s32.totalorder %s386_s3, %s293_s16  ;;  %p297_p8 = scmp.lt.u32.totalorder %s293_s16, %s386_s3 }
 0x124   :  { %p299_p9 = pnand %p297_p8, %p294_p7 }
 0x126   :  { %302 = shalt.err (!%p299_p9)
}
 0x127   :  { %145 = dma.vmem_to_hbm [thread:$0]  %s143_s12, 32, %s386_s3, [#allocation4]  }
 0x128   :  { %307 = dma.done.wait [#allocation4], 32  }
 0x129   :  { %308 = vsyncadd [#allocation4], 4294967264 }
 0x12a   :  { %149 = vsyncpa [#allocation3], 1 }
 0x12b   :  { %150 = vsyncpa [#allocation6], 1 }
 0x12c   :  { %151 = vsyncpa [#allocation4], 1 }

</bundles_post_ra>
